<compile_context>
chip_gen: v7x
topology: tpu7x:2x2x1
jax: 0.10.0
libtpu: 0.0.40
codegen_flags: <defaults>
</compile_context>

<pallas_src>
import jax
import jax.numpy as jnp
from jax.experimental import pallas as pl
from jax.experimental.pallas import tpu as pltpu


def _round_up(x, m):
    return ((x + m - 1) // m) * m


# --------------------------------------------------------------------------
# Kernels
# --------------------------------------------------------------------------
def _resblock_kernel_small(x_ref, w1_ref, b1_ref, w2_ref, b2_ref, o_ref):
    """Whole-H-resident path: both matmuls, biases, residual, ReLUs fused."""
    x = x_ref[...]                                               # (tb, H)
    h = jnp.dot(x, w1_ref[...], preferred_element_type=jnp.float32)
    h = jnp.maximum(h + b1_ref[...], 0.0)                        # fc1 + ReLU (f32)
    y = jnp.dot(h.astype(w2_ref.dtype), w2_ref[...],
                preferred_element_type=jnp.float32)              # fc2
    y = y + b2_ref[...] + x.astype(jnp.float32)                  # bias + residual
    o_ref[...] = jnp.maximum(y, 0.0).astype(o_ref.dtype)


def _resblock_kernel_tiled_k(x_ref, w1_ref, b1_ref, w2_ref, b2_ref, o_ref,
                             acc_ref):
    """Large-H path: stream W1 columns / W2 rows over reduction axis k on the
    intermediate hidden dim; accumulate fc2 partial products in f32 VMEM."""
    k = pl.program_id(1)

    @pl.when(k == 0)
    def _():
        acc_ref[...] = jnp.zeros_like(acc_ref)

    x = x_ref[...]                                               # (tb, H)
    h = jnp.dot(x, w1_ref[...], preferred_element_type=jnp.float32)  # (tb, tk)
    h = jnp.maximum(h + b1_ref[...], 0.0)
    acc_ref[...] += jnp.dot(h.astype(w2_ref.dtype), w2_ref[...],
                            preferred_element_type=jnp.float32)  # (tb, H)

    @pl.when(k == pl.num_programs(1) - 1)
    def _():
        y = acc_ref[...] + b2_ref[...] + x.astype(jnp.float32)
        o_ref[...] = jnp.maximum(y, 0.0).astype(o_ref.dtype)


# --------------------------------------------------------------------------
# Wrapper
# --------------------------------------------------------------------------
def resblock(x, w1, b1, w2, b2, *, tile_b=None, tile_k=512, mxu_dtype=None,
             force_tiled_k=False):
    B, H = x.shape
    out_dtype = x.dtype

    # Optional low-precision MXU inputs (recommended: bf16 on v5e/v6e/v7x).
    if mxu_dtype is not None:
        x = x.astype(mxu_dtype)
        w1 = w1.astype(mxu_dtype)
        w2 = w2.astype(mxu_dtype)
    b1 = b1.astype(jnp.float32).reshape(1, H)
    b2 = b2.astype(jnp.float32).reshape(1, H)

    itemsize = jnp.dtype(x.dtype).itemsize
    row_align = 8 if itemsize >= 4 else 32 // itemsize           # sublane packing

    # Row tile: big enough to feed the MXU and amortize ~0.35us/step overhead,
    # small enough for a multi-iteration grid (pipelining + megacore split).
    if tile_b is None:
        tile_b = min(256, _round_up(B, row_align))
    tile_b = _round_up(tile_b, row_align)

    # Pad ragged batches instead of forcing tile_b == B (keeps the fast path).
    B_pad = _round_up(B, tile_b)
    if B_pad != B:
        x = jnp.pad(x, ((0, B_pad - B), (0, 0)))

    weight_bytes = 2 * H * H * itemsize                          # W1 + W2 (1 buf)
    act_bytes = 4 * tile_b * H * itemsize                        # x/out, 2 bufs each
    use_tiled_k = (force_tiled_k or weight_bytes > (32 << 20)) and H % 128 == 0

    cost = pl.CostEstimate(
        flops=4 * B_pad * H * H,                                 # two matmuls
        transcendentals=0,
        bytes_accessed=int((2 * B_pad * H + 2 * H * H) * itemsize + 2 * H * 4),
    )

    if not use_tiled_k:
        vmem_limit = min(max(2 * (weight_bytes + act_bytes), 32 << 20), 100 << 20)
        const_buf = pl.Buffered(1)  # fetched once; don't double-buffer
        out = pl.pallas_call(
            _resblock_kernel_small,
            out_shape=jax.ShapeDtypeStruct((B_pad, H), out_dtype),
            grid_spec=pltpu.PrefetchScalarGridSpec(
                num_scalar_prefetch=0,
                grid=(B_pad // tile_b,),
                in_specs=[
                    pl.BlockSpec((tile_b, H), lambda i: (i, 0)),          # x tile
                    pl.BlockSpec((H, H), lambda i: (0, 0),
                                 pipeline_mode=const_buf),                # W1
                    pl.BlockSpec((1, H), lambda i: (0, 0),
                                 pipeline_mode=const_buf),                # b1
                    pl.BlockSpec((H, H), lambda i: (0, 0),
                                 pipeline_mode=const_buf),                # W2
                    pl.BlockSpec((1, H), lambda i: (0, 0),
                                 pipeline_mode=const_buf),                # b2
                ],
                out_specs=pl.BlockSpec((tile_b, H), lambda i: (i, 0)),
            ),
            compiler_params=pltpu.CompilerParams(
                dimension_semantics=("parallel",),
                vmem_limit_bytes=int(vmem_limit),
            ),
            cost_estimate=cost,
        )(x, w1, b1, w2, b2)
    else:
        tk = min(tile_k, H)
        if H % tk != 0 or tk % 128 != 0:
            tk = 128
        step_bytes = (2 * 2 * H * tk * itemsize                   # W1/W2 tiles, 2 bufs
                      + 4 * tile_b * H * itemsize                  # x/out, 2 bufs
                      + tile_b * H * 4)                            # f32 accumulator
        vmem_limit = min(max(step_bytes + (8 << 20), 32 << 20), 100 << 20)
        out = pl.pallas_call(
            _resblock_kernel_tiled_k,
            out_shape=jax.ShapeDtypeStruct((B_pad, H), out_dtype),
            grid_spec=pltpu.PrefetchScalarGridSpec(
                num_scalar_prefetch=0,
                grid=(B_pad // tile_b, H // tk),
                in_specs=[
                    pl.BlockSpec((tile_b, H), lambda i, k: (i, 0)),       # x tile
                    pl.BlockSpec((H, tk), lambda i, k: (0, k)),           # W1 cols
                    pl.BlockSpec((1, tk), lambda i, k: (0, k)),           # b1 slice
                    pl.BlockSpec((tk, H), lambda i, k: (k, 0)),           # W2 rows
                    pl.BlockSpec((1, H), lambda i, k: (0, 0),
                                 pipeline_mode=pl.Buffered(1)),           # b2
                ],
                out_specs=pl.BlockSpec((tile_b, H), lambda i, k: (i, 0)),
                scratch_shapes=[pltpu.VMEM((tile_b, H), jnp.float32)],
            ),
            compiler_params=pltpu.CompilerParams(
                dimension_semantics=("parallel", "arbitrary"),
                vmem_limit_bytes=int(vmem_limit),
            ),
            cost_estimate=cost,
        )(x, w1, b1, w2, b2)

    return out[:B] if B_pad != B else out


def resblock_ref(x, w1, b1, w2, b2):
    h = jnp.maximum(x @ w1 + b1, 0.0)
    y = h @ w2 + b2 + x
    return jnp.maximum(y, 0.0)


# --------------------------------------------------------------------------
# Test
# --------------------------------------------------------------------------
if __name__ == "__main__":
    def make_inputs(seed, batch, hidden):
        k_x, k_w1, k_b1, k_w2, k_b2 = jax.random.split(jax.random.PRNGKey(seed), 5)
        bound = 1.0 / jnp.sqrt(hidden)
        x = jax.random.normal(k_x, (batch, hidden), dtype=jnp.float32)
        w1 = jax.random.uniform(k_w1, (hidden, hidden), minval=-bound, maxval=bound,
                                dtype=jnp.float32)
        b1 = jax.random.uniform(k_b1, (hidden,), minval=-bound, maxval=bound,
                                dtype=jnp.float32)
        w2 = jax.random.uniform(k_w2, (hidden, hidden), minval=-bound, maxval=bound,
                                dtype=jnp.float32)
        b2 = jax.random.uniform(k_b2, (hidden,), minval=-bound, maxval=bound,
                                dtype=jnp.float32)
        return x, w1, b1, w2, b2

    # 1) Small shape implied by the module (batch=8, hidden=32), f32 exact path.
    x, w1, b1, w2, b2 = make_inputs(0, 8, 32)
    out = jax.block_until_ready(resblock(x, w1, b1, w2, b2))
    ref = resblock_ref(x, w1, b1, w2, b2)
    assert out.shape == (8, 32)
    assert jnp.allclose(out, ref, atol=1e-5, rtol=1e-5)

    # 2) Ragged batch, multi-tile grid (pipelined / megacore-shardable path).
    x, w1, b1, w2, b2 = make_inputs(1, 300, 256)
    out = jax.block_until_ready(resblock(x, w1, b1, w2, b2, tile_b=128))
    ref = resblock_ref(x, w1, b1, w2, b2)
    assert out.shape == (300, 256)
    assert jnp.allclose(out, ref, atol=2e-4, rtol=2e-4)

    # 3) Exercise the large-H weight-streaming path (forced at a small size).
    x, w1, b1, w2, b2 = make_inputs(2, 64, 256)
    out = jax.block_until_ready(
        resblock(x, w1, b1, w2, b2, tile_k=128, force_tiled_k=True))
    ref = resblock_ref(x, w1, b1, w2, b2)
    assert jnp.allclose(out, ref, atol=2e-4, rtol=2e-4)

    print("KERNEL_OK")
</pallas_src>

<mosaic_0001>
module attributes {stable_mosaic.version = 11 : i64} {
  func.func @_resblock_kernel_small(%arg0: i32, %arg1: memref<8x32xf32, #tpu.memory_space<vmem>>, %arg2: memref<32x32xf32, #tpu.memory_space<vmem>>, %arg3: memref<1x32xf32, #tpu.memory_space<vmem>>, %arg4: memref<32x32xf32, #tpu.memory_space<vmem>>, %arg5: memref<1x32xf32, #tpu.memory_space<vmem>>, %arg6: memref<8x32xf32, #tpu.memory_space<vmem>>) attributes {dimension_semantics = [#tpu.dimension_semantics<parallel>], iteration_bounds = array<i64: 1>, scalar_prefetch = 0 : i64, scratch_operands = 0 : i64, tpu.core_type = #tpu.core_type<tc>, window_params = [{transform_indices = @transform_0, window_bounds = array<i64: 8, 32>}, {pipeline_mode = #tpu.pipeline_mode<synchronous>, transform_indices = @transform_1, window_bounds = array<i64: 32, 32>}, {pipeline_mode = #tpu.pipeline_mode<synchronous>, transform_indices = @transform_2, window_bounds = array<i64: 1, 32>}, {pipeline_mode = #tpu.pipeline_mode<synchronous>, transform_indices = @transform_3, window_bounds = array<i64: 32, 32>}, {pipeline_mode = #tpu.pipeline_mode<synchronous>, transform_indices = @transform_4, window_bounds = array<i64: 1, 32>}, {transform_indices = @transform_5, window_bounds = array<i64: 8, 32>}]} {
    %c0 = arith.constant 0 : index
    %c0_0 = arith.constant 0 : index
    %0 = vector.load %arg1[%c0, %c0_0] : memref<8x32xf32, #tpu.memory_space<vmem>>, vector<8x32xf32>
    %c0_1 = arith.constant 0 : index
    %c0_2 = arith.constant 0 : index
    %1 = vector.load %arg2[%c0_1, %c0_2] : memref<32x32xf32, #tpu.memory_space<vmem>>, vector<32x32xf32>
    %cst = arith.constant dense<0.000000e+00> : vector<8x32xf32>
    %2 = tpu.matmul %0, %1, %cst {dimension_numbers = #tpu.dot_dimension_numbers<[1], [0], [0], [1], [0, 0, 1, 1], [], []>} : vector<8x32xf32>, vector<32x32xf32>, vector<8x32xf32> -> vector<8x32xf32>
    %c0_3 = arith.constant 0 : index
    %c0_4 = arith.constant 0 : index
    %3 = vector.load %arg3[%c0_3, %c0_4] : memref<1x32xf32, #tpu.memory_space<vmem>>, vector<1x32xf32>
    %4 = vector.broadcast %3 : vector<1x32xf32> to vector<8x32xf32>
    %5 = arith.addf %2, %4 : vector<8x32xf32>
    %cst_5 = arith.constant 0.000000e+00 : f32
    %6 = vector.broadcast %cst_5 : f32 to vector<8x32xf32>
    %7 = arith.maximumf %5, %6 : vector<8x32xf32>
    %c0_6 = arith.constant 0 : index
    %c0_7 = arith.constant 0 : index
    %8 = vector.load %arg4[%c0_6, %c0_7] : memref<32x32xf32, #tpu.memory_space<vmem>>, vector<32x32xf32>
    %cst_8 = arith.constant dense<0.000000e+00> : vector<8x32xf32>
    %9 = tpu.matmul %7, %8, %cst_8 {dimension_numbers = #tpu.dot_dimension_numbers<[1], [0], [0], [1], [0, 0, 1, 1], [], []>} : vector<8x32xf32>, vector<32x32xf32>, vector<8x32xf32> -> vector<8x32xf32>
    %c0_9 = arith.constant 0 : index
    %c0_10 = arith.constant 0 : index
    %10 = vector.load %arg5[%c0_9, %c0_10] : memref<1x32xf32, #tpu.memory_space<vmem>>, vector<1x32xf32>
    %11 = vector.broadcast %10 : vector<1x32xf32> to vector<8x32xf32>
    %12 = arith.addf %9, %11 : vector<8x32xf32>
    %13 = arith.addf %12, %0 : vector<8x32xf32>
    %cst_11 = arith.constant 0.000000e+00 : f32
    %14 = vector.broadcast %cst_11 : f32 to vector<8x32xf32>
    %15 = arith.maximumf %13, %14 : vector<8x32xf32>
    %c0_12 = arith.constant 0 : index
    %c0_13 = arith.constant 0 : index
    %16 = vector.load %arg6[%c0_12, %c0_13] : memref<8x32xf32, #tpu.memory_space<vmem>>, vector<8x32xf32>
    tpu.vector_store %arg6[%c0_12, %c0_13], %15 {strides = array<i32>} : memref<8x32xf32, #tpu.memory_space<vmem>>, vector<8x32xf32>,
    return
  }
  func.func @transform_0(%arg0: i32) -> (i32, i32) {
    %c0_i32 = arith.constant 0 : i32
    %c0_i32_0 = arith.constant 0 : i32
    return %arg0, %c0_i32 : i32, i32
  }
  func.func @transform_1(%arg0: i32) -> (i32, i32) {
    %c0_i32 = arith.constant 0 : i32
    %c0_i32_0 = arith.constant 0 : i32
    %c0_i32_1 = arith.constant 0 : i32
    return %c0_i32, %c0_i32_0 : i32, i32
  }
  func.func @transform_2(%arg0: i32) -> (i32, i32) {
    %c0_i32 = arith.constant 0 : i32
    %c0_i32_0 = arith.constant 0 : i32
    %c0_i32_1 = arith.constant 0 : i32
    return %c0_i32, %c0_i32_0 : i32, i32
  }
  func.func @transform_3(%arg0: i32) -> (i32, i32) {
    %c0_i32 = arith.constant 0 : i32
    %c0_i32_0 = arith.constant 0 : i32
    %c0_i32_1 = arith.constant 0 : i32
    return %c0_i32, %c0_i32_0 : i32, i32
  }
  func.func @transform_4(%arg0: i32) -> (i32, i32) {
    %c0_i32 = arith.constant 0 : i32
    %c0_i32_0 = arith.constant 0 : i32
    %c0_i32_1 = arith.constant 0 : i32
    return %c0_i32, %c0_i32_0 : i32, i32
  }
  func.func @transform_5(%arg0: i32) -> (i32, i32) {
    %c0_i32 = arith.constant 0 : i32
    %c0_i32_0 = arith.constant 0 : i32
    return %arg0, %c0_i32 : i32, i32
  }
}

</mosaic_0001>

<bundles_post_ra>
// kernel: tpu_custom_call.1
= control target key start
LH: loop header
LB: loop body
LE: loop exit
PB: predicated region body
PF: predicated region fallthrough
CT: control target
= control target key end

     0   :  { %10 = vsyncpa [#allocation3], 0  ;;  %s503_s0 = inlined_call_operand.hbm [shape: f32[8,32], index: 0, kind: input, shape index: {}]   ;;  %s504_s1 = inlined_call_operand.hbm [shape: f32[32,32], index: 1, kind: input, shape index: {}]   ;;  %s505_s2 = inlined_call_operand.vmem [shape: f32[1,32], index: 2, kind: input, shape index: {}]   ;;  %s506_s3 = inlined_call_operand.hbm [shape: f32[32,32], index: 3, kind: input, shape index: {}]   ;;  %s507_s4 = inlined_call_operand.vmem [shape: f32[1,32], index: 4, kind: input, shape index: {}]   ;;  %s508_s5 = inlined_call_operand.hbm [shape: f32[8,32], index: 5, kind: output, shape index: {}]  }
   0x1   :  { %11 = vsyncpa [#allocation6], 0 }
   0x2   :  { %12 = vsyncpa [#allocation4], 0  ;;  %s401_s18 = smov [#allocation5]   ;;  %s307_s22 = scalar_lea.hbm %s504_s1, 512 }
   0x3   :  { %s28_s19 = sshll.u32 %s401_s18, 4  ;;  %p308_p0 = scmp.ne.s32.totalorder %s504_s1, %s307_s22  ;;  %s29_s19 = int_to_ptr.vmem [resolvable:$true] %s28_s19 }
   0x4   :  { %p311_p1 = scmp.lt.u32.totalorder %s307_s22, %s504_s1 }
   0x6   :  { %p313_p2 = pnand %p311_p1, %p308_p0 }
   0x8   :  { %316 = shalt.err (!%p313_p2)
}
   0x9   :  { %s317_s27 = scalar_lea.vmem %s29_s19, 512  ;;  %p322_p4 = scmp.lt.s32.totalorder %s29_s19, %s29_s19 }
   0xa   :  { %p318_p3 = scmp.ne.s32.totalorder %s29_s19, %s317_s27  ;;  %p323_p5 = scmp.lt.s32.totalorder %s317_s27, %s317_s27 }
   0xc   :  { %p324_p6 = por %p323_p5, %p322_p4 }
   0xe   :  { %p325_p7 = pnand %p324_p6, %p318_p3 }
  0x10   :  { %328 = shalt.err (!%p325_p7)
}
  0x11   :  { %s402_s28 = smov 128   ;;  %s403_s29 = smov 8  }
  0x12   :  { %34 = dma.hbm_to_vmem [thread:$0]  %s504_s1, 512, %s29_s19, [#allocation6], %s402_s28, %s402_s28, %s403_s29  }
  0x13   :  { %s404_s7 = smov [#allocation2]   ;;  %s405_s9 = smov [#allocation7]  }
  0x14   :  { %s19_s8 = sshll.u32 %s404_s7, 4  ;;  %s42_s10 = sshll.u32 %s405_s9, 4  ;;  %s20_s8 = int_to_ptr.vmem [resolvable:$true] %s19_s8  ;;  %s43_s10 = int_to_ptr.vmem [resolvable:$true] %s42_s10 }
  0x15   :  { %s329_s13 = scalar_lea.hbm %s503_s0, 128 }
  0x16   :  { %p330_p8 = scmp.ne.s32.totalorder %s503_s0, %s329_s13  ;;  %p333_p9 = scmp.lt.u32.totalorder %s329_s13, %s503_s0 }
  0x18   :  { %p335_p10 = pnand %p333_p9, %p330_p8 }
  0x1a   :  { %338 = shalt.err (!%p335_p10)
}
  0x1b   :  { %s339_s1 = scalar_lea.vmem %s20_s8, 128  ;;  %p344_p12 = scmp.lt.s32.totalorder %s20_s8, %s20_s8 }
  0x1c   :  { %p340_p11 = scmp.ne.s32.totalorder %s20_s8, %s339_s1  ;;  %p345_p13 = scmp.lt.s32.totalorder %s339_s1, %s339_s1 }
  0x1e   :  { %p346_p0 = por %p345_p13, %p344_p12 }
  0x20   :  { %p347_p1 = pnand %p346_p0, %p340_p11 }
  0x22   :  { %350 = shalt.err (!%p347_p1)
}
  0x23   :  { %22 = dma.hbm_to_vmem [thread:$0]  %s503_s0, 128, %s20_s8, [#allocation3]  }
  0x24   :  { %s351_s22 = scalar_lea.hbm %s506_s3, 512 }
  0x25   :  { %p352_p2 = scmp.ne.s32.totalorder %s506_s3, %s351_s22  ;;  %p355_p3 = scmp.lt.u32.totalorder %s351_s22, %s506_s3 }
  0x27   :  { %p357_p4 = pnand %p355_p3, %p352_p2 }
  0x29   :  { %360 = shalt.err (!%p357_p4)
}
  0x2a   :  { %s361_s27 = scalar_lea.vmem %s43_s10, 512  ;;  %p366_p6 = scmp.lt.s32.totalorder %s43_s10, %s43_s10 }
  0x2b   :  { %p362_p5 = scmp.ne.s32.totalorder %s43_s10, %s361_s27  ;;  %p367_p7 = scmp.lt.s32.totalorder %s361_s27, %s361_s27 }
  0x2d   :  { %p368_p8 = por %p367_p7, %p366_p6 }
  0x2f   :  { %p369_p9 = pnand %p368_p8, %p362_p5 }
  0x31   :  { %372 = shalt.err (!%p369_p9)
}
  0x32   :  { %48 = dma.hbm_to_vmem [thread:$0]  %s506_s3, 512, %s43_s10, [#allocation6], %s402_s28, %s402_s28, %s403_s29  }
  0x33   :  { %395 = dma.done.wait [#allocation3], 128  }
  0x34   :  { %396 = vsyncadd [#allocation3], 4294967168 }
  0x35   :  { %397 = dma.done.wait [#allocation6], 1024  }
  0x36   :  { %398 = vsyncadd [#allocation6], 4294966272  ;;  %v406_v0 = vmov 0.0|0.0   ;;  %vm407_vm0 = vmmov 0   ;;  %v408_v1 = vmov 0.0   ;;  %v61_v2 = vld [vmem:[#allocation5] sm:$0xff] }
  0x37   :  { %286 = vmatprep.subr.bf16.mxu0 %v406_v0  ;;  %272 = vmatprep.mubr.msk.f32.mxu0 %vm407_vm0, %v408_v1  ;;  %v62_v3 = vld [vmem:[#allocation5 + $0x8] sm:$0xff]  ;;  %v63_v4 = vld [vmem:[#allocation5 + $0x10] sm:$0xff]  ;;  %v64_v6 = vld [vmem:[#allocation5 + $0x18] sm:$0xff]  ;;  %vm72_vm1 = vcmask 261120   ;;  %s409_s7 = smov [#allocation8]  }
  0x38   :  { %292 = vmatprep.subr.bf16.mxu1 %v406_v0  ;;  %283 = vmatprep.mubr.msk.f32.mxu1 %vm407_vm0, %v408_v1  ;;  %v287_v5 = vpack.c.bf16 %v62_v3, %v61_v2  ;;  %v147_v7 = vld [vmem:[#allocation7] sm:$0xff]  ;;  %v148_v8 = vld [vmem:[#allocation7 + $0x8] sm:$0xff]  ;;  %v290_v9 = vpack.c.bf16 %v64_v6, %v63_v4  ;;  %v60_v11 = vld [vmem:[#allocation2] sm:$0xff]  ;;  %s240_s8 = sshll.u32 %s409_s7, 4  ;;  %s241_s8 = int_to_ptr.vmem [resolvable:$true] %s240_s8 }
  0x39   :  { %v293_v10 = vpack.c.bf16 %v148_v8, %v147_v7  ;;  %v149_v12 = vld [vmem:[#allocation7 + $0x10] sm:$0xff]  ;;  %v150_v13 = vld [vmem:[#allocation7 + $0x18] sm:$0xff]  ;;  %p378_p11 = scmp.lt.s32.totalorder %s241_s8, %s241_s8 }
  0x3a   :  { %288 = vmatpush3.bf16.msra.mxu0 %v287_v5  ;;  %v296_v14 = vpack.c.bf16 %v150_v13, %v149_v12  ;;  %v250_v15 = vld [vmem:[%s505_s2] ss:$0 sm:$0xff]  ;;  %s373_s2 = scalar_lea.vmem %s241_s8, 128 }
  0x3b   :  { %289 = vmatprep.subr.bf16.mxu0 %v406_v0  ;;  %294 = vmatpush3.bf16.msra.mxu1 %v293_v10  ;;  %v252_v20 = vld [vmem:[%s507_s4] ss:$0 sm:$0xff]  ;;  %p374_p10 = scmp.ne.s32.totalorder %s241_s8, %s373_s2  ;;  %p379_p12 = scmp.lt.s32.totalorder %s373_s2, %s373_s2 }
  0x3c   :  { %295 = vmatprep.subr.bf16.mxu1 %v406_v0 }
  0x3d   :  { %p380_p13 = por %p379_p12, %p378_p11 }
  0x3e   :  { %291 = vmatpush3.bf16.msra.mxu0 %v290_v9 }
  0x3f   :  { %297 = vmatpush3.bf16.msra.mxu1 %v296_v14  ;;  %p381_p0 = pnand %p380_p13, %p374_p10 }
  0x41   :  { %273 = vmatmul.mubr.msk.f32.vlgmr.msra.gmra.mrb[0].mxu0 %vm72_vm1, %v60_v11 }
 0x114   :  { %v142_v16 = vpop.f32.mrb[0].mxu0 }
 0x115   :  { %v143_v17 = vadd.f32 %v250_v15, %v142_v16  ;;  %v274_v18 = vpop.f32.mrb[1].mxu0 }
 0x117   :  { %v146_v19 = vmax.f32 %v143_v17, 0.0 }
 0x119   :  { %284 = vmatmul.mubr.msk.f32.vlgmr.msra.gmra.mrb[0].mxu1 %vm72_vm1, %v146_v19 }
 0x1ec   :  { %v227_v21 = vpop.f32.mrb[0].mxu1 }
 0x1ed   :  { %v228_v22 = vadd.f32 %v252_v20, %v227_v21  ;;  %v285_v23 = vpop.f32.mrb[1].mxu1 }
 0x1ef   :  { %v231_v24 = vadd.f32 %v228_v22, %v60_v11 }
 0x1f1   :  { %v232_v25 = vmax.f32 %v231_v24, 0.0 }
 0x1f3   :  { %233 = vst.msk [vmem:[#allocation8] sm:$0xff] %vm72_vm1, %v232_v25 }
 0x1f4   :  { %384 = shalt.err (!%p381_p0)
}
 0x1f5   :  { %s385_s4 = scalar_lea.hbm %s508_s5, 128 }
 0x1f6   :  { %p386_p1 = scmp.ne.s32.totalorder %s508_s5, %s385_s4  ;;  %p389_p2 = scmp.lt.u32.totalorder %s385_s4, %s508_s5 }
 0x1f8   :  { %p391_p3 = pnand %p389_p2, %p386_p1 }
 0x1fa   :  { %394 = shalt.err (!%p391_p3)
}
 0x1fb   :  { %243 = dma.vmem_to_hbm [thread:$0]  %s241_s8, 128, %s508_s5, [#allocation4]  }
 0x1fc   :  { %399 = dma.done.wait [#allocation4], 128  }
 0x1fd   :  { %400 = vsyncadd [#allocation4], 4294967168 }
 0x1fe   :  { %247 = vsyncpa [#allocation3], 1 }
 0x1ff   :  { %248 = vsyncpa [#allocation6], 1 }
 0x200   :  { %249 = vsyncpa [#allocation4], 1 }

</bundles_post_ra>
